<compile_context>
chip_gen: v6e
topology: v6e:2x2x1
jax: 0.10.0
libtpu: 0.0.40
codegen_flags: <defaults>
</compile_context>

<pallas_src>
import math

import numpy as np

import jax
import jax.numpy as jnp
from jax.experimental import pallas as pl
from jax.experimental.pallas import tpu as pltpu


# Taylor coefficients of sin(2*pi*s) in s (exact to double, cast to f32 at use).
_TWO_PI = 2.0 * math.pi
_C1 = _TWO_PI
_C3 = -_TWO_PI ** 3 / 6.0
_C5 = _TWO_PI ** 5 / 120.0
_C7 = -_TWO_PI ** 7 / 5040.0
_C9 = _TWO_PI ** 9 / 362880.0
_C11 = -_TWO_PI ** 11 / 39916800.0


def _gfp_kernel(x_ref, w_ref, ph_ref, out_ref):
    # x_ref : [1, TB]   time steps (lane-major row)
    # w_ref : [1, E]    concat([W, W])           (E = embed_dim)
    # ph_ref: [1, E]    concat([0]*half, [0.25]*half)  (phase in turns)
    # out_ref:[TB, E]
    x_col = jnp.transpose(x_ref[...], (1, 0))        # [TB, 1] (few-vreg relayout)

    # Angle in "turns": out = sin(2*pi*(x*W + phase)); phase=0.25 gives the cos half.
    y = x_col * w_ref[...] + ph_ref[...]              # [TB, E]

    # Trivial range reduction: for |y| < 2^23, y - nearest_int(y) is exact.
    r = y - jnp.floor(y + 0.5)                        # r in [-0.5, 0.5]
    q = jnp.floor(2.0 * r + 0.5)                      # quadrant in {-1, 0, 1}
    s = r - 0.5 * q                                   # s in [-0.25, 0.25]
    sign = 1.0 - 2.0 * jnp.abs(q)                     # (-1)^q

    # Odd polynomial for sin(2*pi*s), |2*pi*s| <= pi/2 (abs err ~1e-7).
    s2 = s * s
    p = _C11
    p = p * s2 + _C9
    p = p * s2 + _C7
    p = p * s2 + _C5
    p = p * s2 + _C3
    p = p * s2 + _C1

    out_ref[...] = (sign * (p * s)).astype(out_ref.dtype)


def gaussian_fourier_projection(x, w, *, block_rows=2048):
    """x: [B] float32 time steps, w: [half] float32  ->  [B, 2*half] float32."""
    b = int(x.shape[0])
    half = int(w.shape[0])
    embed_dim = 2 * half

    x_row = x.reshape(1, b).astype(jnp.float32)
    w32 = w.astype(jnp.float32)
    w_cat = jnp.concatenate([w32, w32]).reshape(1, embed_dim)
    phase = jnp.concatenate(
        [jnp.zeros((half,), jnp.float32), jnp.full((half,), 0.25, jnp.float32)]
    ).reshape(1, embed_dim)

    # Row tile: a multiple of 128 so the lane-dim x block and the sublane-dim
    # output block stay aligned; if the whole batch fits in one block we take
    # it exactly (block == full dim).  The ragged last block is masked by
    # Pallas, so there is no pad / post-call slice epilogue.
    block_rows = max(128, (block_rows // 128) * 128)
    tb = b if b <= block_rows else block_rows
    grid = (pl.cdiv(b, tb),)

    cost = pl.CostEstimate(
        flops=30 * b * embed_dim,          # reduction + degree-11 polynomial
        transcendentals=0,                 # hand-expanded; no libm calls
        bytes_accessed=4 * (b + 2 * embed_dim + b * embed_dim),
    )

    return pl.pallas_call(
        _gfp_kernel,
        out_shape=jax.ShapeDtypeStruct((b, embed_dim), jnp.float32),
        grid=grid,
        in_specs=[
            pl.BlockSpec((1, tb), lambda i: (0, i)),            # x row tile
            pl.BlockSpec((1, embed_dim), lambda i: (0, 0)),     # W (VMEM-resident)
            pl.BlockSpec((1, embed_dim), lambda i: (0, 0)),     # phase (VMEM-resident)
        ],
        out_specs=pl.BlockSpec((tb, embed_dim), lambda i: (i, 0)),
        compiler_params=pltpu.CompilerParams(
            dimension_semantics=("parallel",),
            vmem_limit_bytes=64 * 1024 * 1024,
        ),
        cost_estimate=cost,
    )(x_row, w_cat, phase)


def _reference_f64(x, w):
    """Ground-truth (float64) port of the PyTorch forward."""
    xf = np.asarray(x, dtype=np.float64)
    wf = np.asarray(w, dtype=np.float64)
    proj = xf[:, None] * wf[None, :] * 2.0 * np.pi
    return np.concatenate([np.sin(proj), np.cos(proj)], axis=-1)


if __name__ == "__main__":
    key = jax.random.PRNGKey(0)
    k_w, k_x1, k_x2, k_x3 = jax.random.split(key, 4)

    embed_dim = 256           # half = 128 -> lane-aligned feature dim
    scale = 30.0

    # Mirrors torch.randn(embed_dim // 2) * scale (fixed, non-trainable).
    W = jax.random.normal(k_w, (embed_dim // 2,), dtype=jnp.float32) * scale

    # |2*pi*x*W| reaches O(1e3), so any f32 evaluation (this kernel or the
    # torch module) carries ~1e-4 abs error from argument rounding alone.
    tol = 5e-4

    # Case 1: typical tiny batch of timestep scalars (single block).
    x1 = jax.random.uniform(k_x1, (8,), dtype=jnp.float32)
    o1 = jax.block_until_ready(gaussian_fourier_projection(x1, W))
    assert o1.shape == (8, embed_dim)
    assert np.max(np.abs(np.asarray(o1, np.float64) - _reference_f64(x1, W))) < tol

    # Case 2: batch not a multiple of 8 (single block equal to the full dims).
    x2 = jax.random.uniform(k_x2, (203,), dtype=jnp.float32)
    o2 = jax.block_until_ready(gaussian_fourier_projection(x2, W))
    assert o2.shape == (203, embed_dim)
    assert np.max(np.abs(np.asarray(o2, np.float64) - _reference_f64(x2, W))) < tol

    # Case 3: multi-block grid with a masked ragged last block (300 = 2*128 + 44).
    x3 = jax.random.uniform(k_x3, (300,), dtype=jnp.float32)
    o3 = jax.block_until_ready(gaussian_fourier_projection(x3, W, block_rows=128))
    assert o3.shape == (300, embed_dim)
    assert np.max(np.abs(np.asarray(o3, np.float64) - _reference_f64(x3, W))) < tol

    print("KERNEL_OK")
</pallas_src>

<mosaic_0001>
module attributes {stable_mosaic.version = 11 : i64} {
  func.func @_gfp_kernel(%arg0: i32, %arg1: memref<1x8xf32, #tpu.memory_space<vmem>>, %arg2: memref<1x256xf32, #tpu.memory_space<vmem>>, %arg3: memref<1x256xf32, #tpu.memory_space<vmem>>, %arg4: memref<8x256xf32, #tpu.memory_space<vmem>>) attributes {dimension_semantics = [#tpu.dimension_semantics<parallel>], iteration_bounds = array<i64: 1>, scalar_prefetch = 0 : i64, scratch_operands = 0 : i64, tpu.core_type = #tpu.core_type<tc>, window_params = [{transform_indices = @transform_0, window_bounds = array<i64: 1, 8>}, {pipeline_mode = #tpu.pipeline_mode<synchronous>, transform_indices = @transform_1, window_bounds = array<i64: 1, 256>}, {pipeline_mode = #tpu.pipeline_mode<synchronous>, transform_indices = @transform_2, window_bounds = array<i64: 1, 256>}, {transform_indices = @transform_3, window_bounds = array<i64: 8, 256>}]} {
    %c0 = arith.constant 0 : index
    %c0_0 = arith.constant 0 : index
    %0 = vector.load %arg1[%c0, %c0_0] : memref<1x8xf32, #tpu.memory_space<vmem>>, vector<1x8xf32>
    %1 = tpu.transpose %0, [1, 0] : vector<1x8xf32> -> vector<8x1xf32>
    %c0_1 = arith.constant 0 : index
    %c0_2 = arith.constant 0 : index
    %2 = vector.load %arg2[%c0_1, %c0_2] : memref<1x256xf32, #tpu.memory_space<vmem>>, vector<1x256xf32>
    %3 = vector.broadcast %1 : vector<8x1xf32> to vector<8x256xf32>
    %4 = vector.broadcast %2 : vector<1x256xf32> to vector<8x256xf32>
    %5 = arith.mulf %3, %4 : vector<8x256xf32>
    %c0_3 = arith.constant 0 : index
    %c0_4 = arith.constant 0 : index
    %6 = vector.load %arg3[%c0_3, %c0_4] : memref<1x256xf32, #tpu.memory_space<vmem>>, vector<1x256xf32>
    %7 = vector.broadcast %6 : vector<1x256xf32> to vector<8x256xf32>
    %8 = arith.addf %5, %7 : vector<8x256xf32>
    %cst = arith.constant 5.000000e-01 : f32
    %9 = vector.broadcast %cst : f32 to vector<8x256xf32>
    %10 = arith.addf %8, %9 : vector<8x256xf32>
    %11 = math.floor %10 : vector<8x256xf32>
    %12 = arith.subf %8, %11 : vector<8x256xf32>
    %cst_5 = arith.constant 2.000000e+00 : f32
    %13 = vector.broadcast %cst_5 : f32 to vector<8x256xf32>
    %14 = arith.mulf %13, %12 : vector<8x256xf32>
    %cst_6 = arith.constant 5.000000e-01 : f32
    %15 = vector.broadcast %cst_6 : f32 to vector<8x256xf32>
    %16 = arith.addf %14, %15 : vector<8x256xf32>
    %17 = math.floor %16 : vector<8x256xf32>
    %cst_7 = arith.constant 5.000000e-01 : f32
    %18 = vector.broadcast %cst_7 : f32 to vector<8x256xf32>
    %19 = arith.mulf %18, %17 : vector<8x256xf32>
    %20 = arith.subf %12, %19 : vector<8x256xf32>
    %21 = math.absf %17 : vector<8x256xf32>
    %cst_8 = arith.constant 2.000000e+00 : f32
    %22 = vector.broadcast %cst_8 : f32 to vector<8x256xf32>
    %23 = arith.mulf %22, %21 : vector<8x256xf32>
    %cst_9 = arith.constant 1.000000e+00 : f32
    %24 = vector.broadcast %cst_9 : f32 to vector<8x256xf32>
    %25 = arith.subf %24, %23 : vector<8x256xf32>
    %26 = arith.mulf %20, %20 : vector<8x256xf32>
    %cst_10 = arith.constant -15.0946426 : f32
    %27 = vector.broadcast %cst_10 : f32 to vector<8x256xf32>
    %28 = arith.mulf %27, %26 : vector<8x256xf32>
    %cst_11 = arith.constant 42.0586929 : f32
    %29 = vector.broadcast %cst_11 : f32 to vector<8x256xf32>
    %30 = arith.addf %28, %29 : vector<8x256xf32>
    %31 = arith.mulf %30, %26 : vector<8x256xf32>
    %cst_12 = arith.constant -76.7058563 : f32
    %32 = vector.broadcast %cst_12 : f32 to vector<8x256xf32>
    %33 = arith.addf %31, %32 : vector<8x256xf32>
    %34 = arith.mulf %33, %26 : vector<8x256xf32>
    %cst_13 = arith.constant 81.6052475 : f32
    %35 = vector.broadcast %cst_13 : f32 to vector<8x256xf32>
    %36 = arith.addf %34, %35 : vector<8x256xf32>
    %37 = arith.mulf %36, %26 : vector<8x256xf32>
    %cst_14 = arith.constant -4.134170e+01 : f32
    %38 = vector.broadcast %cst_14 : f32 to vector<8x256xf32>
    %39 = arith.addf %37, %38 : vector<8x256xf32>
    %40 = arith.mulf %39, %26 : vector<8x256xf32>
    %cst_15 = arith.constant 6.28318548 : f32
    %41 = vector.broadcast %cst_15 : f32 to vector<8x256xf32>
    %42 = arith.addf %40, %41 : vector<8x256xf32>
    %43 = arith.mulf %42, %20 : vector<8x256xf32>
    %44 = arith.mulf %25, %43 : vector<8x256xf32>
    %c0_16 = arith.constant 0 : index
    %c0_17 = arith.constant 0 : index
    %45 = vector.load %arg4[%c0_16, %c0_17] : memref<8x256xf32, #tpu.memory_space<vmem>>, vector<8x256xf32>
    tpu.vector_store %arg4[%c0_16, %c0_17], %44 {strides = array<i32>} : memref<8x256xf32, #tpu.memory_space<vmem>>, vector<8x256xf32>,
    return
  }
  func.func @transform_0(%arg0: i32) -> (i32, i32) {
    %c0_i32 = arith.constant 0 : i32
    %c0_i32_0 = arith.constant 0 : i32
    return %c0_i32, %arg0 : i32, i32
  }
  func.func @transform_1(%arg0: i32) -> (i32, i32) {
    %c0_i32 = arith.constant 0 : i32
    %c0_i32_0 = arith.constant 0 : i32
    %c0_i32_1 = arith.constant 0 : i32
    return %c0_i32, %c0_i32_0 : i32, i32
  }
  func.func @transform_2(%arg0: i32) -> (i32, i32) {
    %c0_i32 = arith.constant 0 : i32
    %c0_i32_0 = arith.constant 0 : i32
    %c0_i32_1 = arith.constant 0 : i32
    return %c0_i32, %c0_i32_0 : i32, i32
  }
  func.func @transform_3(%arg0: i32) -> (i32, i32) {
    %c0_i32 = arith.constant 0 : i32
    %c0_i32_0 = arith.constant 0 : i32
    return %arg0, %c0_i32 : i32, i32
  }
}

</mosaic_0001>

<bundles_post_ra>
// kernel: tpu_custom_call.1
= control target key start
LH: loop header
LB: loop body
LE: loop exit
PB: predicated region body
PF: predicated region fallthrough
CT: control target
= control target key end

     0   :  { %8 = vsyncpa [#allocation3], 0  ;;  %s279_s0 = inlined_call_operand.hbm [shape: f32[1,8], index: 0, kind: input, shape index: {}]   ;;  %s280_s1 = inlined_call_operand.hbm [shape: f32[1,256], index: 1, kind: input, shape index: {}]   ;;  %s281_s2 = inlined_call_operand.vmem [shape: f32[1,256], index: 2, kind: input, shape index: {}]   ;;  %s282_s3 = inlined_call_operand.hbm [shape: f32[8,256], index: 3, kind: output, shape index: {}]  }
   0x1   :  { %9 = vsyncpa [#allocation6], 0 }
   0x2   :  { %10 = vsyncpa [#allocation4], 0  ;;  %s243_s12 = smov [#allocation2]   ;;  %s244_s14 = smov [#allocation5]  }
   0x3   :  { %s17_s13 = sshll.u32 %s243_s12, 4  ;;  %s27_s15 = sshll.u32 %s244_s14, 4  ;;  %s18_s13 = int_to_ptr.vmem [resolvable:$true] %s17_s13  ;;  %s28_s15 = int_to_ptr.vmem [resolvable:$true] %s27_s15 }
   0x4   :  { %s185_s16 = scalar_lea.vmem %s18_s13, 16  ;;  %s189_s17 = scalar_lea.vmem %s18_s13, 32 }
   0x5   :  { %p186_p0 = scmp.ne.s32.totalorder %s18_s13, %s185_s16  ;;  %p190_p1 = scmp.lt.s32.totalorder %s18_s13, %s18_s13 }
   0x6   :  { %p191_p2 = scmp.lt.s32.totalorder %s189_s17, %s185_s16 }
   0x8   :  { %p192_p3 = por %p191_p2, %p190_p1 }
   0xa   :  { %p193_p4 = pnand %p192_p3, %p186_p0 }
   0xc   :  { %196 = shalt.err (!%p193_p4)
}
   0xd   :  { %20 = dma.hbm_to_vmem [thread:$0]  %s279_s0, 16, %s18_s13, [#allocation3]  }
   0xe   :  { %s205_s20 = scalar_lea.vmem %s28_s15, 32  ;;  %p210_p6 = scmp.lt.s32.totalorder %s28_s15, %s28_s15 }
   0xf   :  { %p206_p5 = scmp.ne.s32.totalorder %s28_s15, %s205_s20  ;;  %p211_p7 = scmp.lt.s32.totalorder %s205_s20, %s205_s20 }
  0x11   :  { %p212_p8 = por %p211_p7, %p210_p6 }
  0x13   :  { %p213_p9 = pnand %p212_p8, %p206_p5 }
  0x15   :  { %216 = shalt.err (!%p213_p9)
}
  0x16   :  { %30 = dma.hbm_to_vmem [thread:$0]  %s280_s1, 32, %s28_s15, [#allocation6]  }
  0x17   :  { %237 = dma.done.wait [#allocation3], 16  }
  0x18   :  { %238 = vsyncadd [#allocation3], 4294967280 }
  0x19   :  { %239 = dma.done.wait [#allocation6], 32  }
  0x1a   :  { %240 = vsyncadd [#allocation6], 4294967264  ;;  %v39_v0 = vld [vmem:[#allocation2] sm:$0x1]  ;;  %v245_v1 = vmov 0   ;;  %v79_v3 = vlaneseq  ;;  %s246_s1 = smov [#allocation7]  }
  0x1b   :  { %40 = vxpose.xlu0.b32.start.end [1/1] (short) (narrow) %v39_v0, 8  ;;  %v72_v7 = vld [vmem:[#allocation5] sm:$0x3]  ;;  %v91_v8 = vld [vmem:[%s281_s2] sm:$0x3]  ;;  %s161_s2 = sshll.u32 %s246_s1, 4  ;;  %s162_s2 = int_to_ptr.vmem [resolvable:$true] %s161_s2 }
  0x1c   :  { %v80_v4 = vshrl.u32 %v79_v3, 7  ;;  %s217_s24 = scalar_lea.vmem %s162_s2, 256  ;;  %p222_p11 = scmp.lt.s32.totalorder %s162_s2, %s162_s2 }
  0x1d   :  { %p218_p10 = scmp.ne.s32.totalorder %s162_s2, %s217_s24  ;;  %p223_p12 = scmp.lt.s32.totalorder %s217_s24, %s217_s24 }
  0x1e   :  { %v81_v5 = vsub.s32 0, %v80_v4  ;;  %v85_v6 = vsub.s32 1, %v80_v4 }
  0x1f   :  { %p224_p13 = por %p223_p12, %p222_p11 }
  0x20   :  { %v82_v9 = vrot.slane %v72_v7, %v81_v5  ;;  %v86_v10 = vrot.slane %v72_v7, %v85_v6  ;;  %v96_v11 = vrot.slane %v91_v8, %v81_v5  ;;  %v100_v12 = vrot.slane %v91_v8, %v85_v6 }
  0x21   :  { %p225_p0 = pnand %p224_p13, %p218_p10 }
  0x44   :  { %176 = vset.pattern.permute.xlu0 %v245_v1 }
  0x97   :  { %v56_v2 = vpop.trf.xlu0 }
  0x98   :  { %75 = vperm.xlu0 %176, %v56_v2  }
 0x113   :  { %v76_v13 = vpop.permute.xlu0 %75 }
 0x114   :  { %v89_v14 = vmul.f32 %v82_v9, %v76_v13  ;;  %v90_v15 = vmul.f32 %v86_v10, %v76_v13 }
 0x116   :  { %v103_v16 = vadd.f32 %v96_v11, %v89_v14  ;;  %v104_v17 = vadd.f32 %v100_v12, %v90_v15 }
 0x118   :  { %v105_v18 = vadd.f32 0.5, %v103_v16  ;;  %v106_v19 = vadd.f32 0.5, %v104_v17 }
 0x11a   :  { %v107_v20 = vfloor.f32 %v105_v18  ;;  %v108_v21 = vfloor.f32 %v106_v19 }
 0x11c   :  { %v109_v22 = vsub.f32 %v103_v16, %v107_v20  ;;  %v110_v23 = vsub.f32 %v104_v17, %v108_v21 }
 0x11e   :  { %v111_v24 = vmul.f32 2.0, %v109_v22  ;;  %v112_v25 = vmul.f32 2.0, %v110_v23 }
 0x120   :  { %v113_v26 = vadd.f32 0.5, %v111_v24  ;;  %v114_v27 = vadd.f32 0.5, %v112_v25 }
 0x122   :  { %v115_v28 = vfloor.f32 %v113_v26  ;;  %v116_v29 = vfloor.f32 %v114_v27 }
 0x124   :  { %v117_v30 = vmul.f32 0.5, %v115_v28  ;;  %v118_v31 = vmul.f32 0.5, %v116_v29  ;;  %v121_v48 = vand.u32 2147483647, %v115_v28  ;;  %v122_v49 = vand.u32 2147483647, %v116_v29 }
 0x126   :  { %v119_v32 = vsub.f32 %v109_v22, %v117_v30  ;;  %v120_v33 = vsub.f32 %v110_v23, %v118_v31  ;;  %v123_v54 = vmul.f32 2.0, %v121_v48  ;;  %v124_v55 = vmul.f32 2.0, %v122_v49 }
 0x128   :  { %v127_v34 = vmul.f32 %v119_v32, %v119_v32  ;;  %v128_v35 = vmul.f32 %v120_v33, %v120_v33  ;;  %v125_v60 = vsub.f32 1.0, %v123_v54  ;;  %v126_v61 = vsub.f32 1.0, %v124_v55 }
 0x12a   :  { %v129_v36 = vmul.f32 -15.094643, %v127_v34  ;;  %v130_v37 = vmul.f32 -15.094643, %v128_v35 }
 0x12c   :  { %v131_v38 = vadd.f32 42.058693, %v129_v36  ;;  %v132_v39 = vadd.f32 42.058693, %v130_v37 }
 0x12e   :  { %v133_v40 = vmul.f32 %v131_v38, %v127_v34  ;;  %v134_v41 = vmul.f32 %v132_v39, %v128_v35 }
 0x130   :  { %v135_v42 = vadd.f32 -76.70586, %v133_v40  ;;  %v136_v43 = vadd.f32 -76.70586, %v134_v41 }
 0x132   :  { %v137_v44 = vmul.f32 %v135_v42, %v127_v34  ;;  %v138_v45 = vmul.f32 %v136_v43, %v128_v35 }
 0x134   :  { %v139_v46 = vadd.f32 81.60525, %v137_v44  ;;  %v140_v47 = vadd.f32 81.60525, %v138_v45 }
 0x136   :  { %v141_v50 = vmul.f32 %v139_v46, %v127_v34  ;;  %v142_v51 = vmul.f32 %v140_v47, %v128_v35 }
 0x138   :  { %v143_v52 = vadd.f32 -41.3417, %v141_v50  ;;  %v144_v53 = vadd.f32 -41.3417, %v142_v51 }
 0x13a   :  { %v145_v56 = vmul.f32 %v143_v52, %v127_v34  ;;  %v146_v57 = vmul.f32 %v144_v53, %v128_v35 }
 0x13c   :  { %v147_v58 = vadd.f32 6.2831855, %v145_v56  ;;  %v148_v59 = vadd.f32 6.2831855, %v146_v57 }
 0x13e   :  { %v149_v62 = vmul.f32 %v147_v58, %v119_v32  ;;  %v150_v63 = vmul.f32 %v148_v59, %v120_v33 }
 0x140   :  { %v151_v0 = vmul.f32 %v149_v62, %v125_v60  ;;  %v152_v1 = vmul.f32 %v150_v63, %v126_v61 }
 0x142   :  { %153 = vst [vmem:[#allocation7] sm:$0xff] %v151_v0  ;;  %154 = vst [vmem:[#allocation7 + $0x8] sm:$0xff] %v152_v1 }
 0x143   :  { %228 = shalt.err (!%p225_p0)
}
 0x144   :  { %164 = dma.vmem_to_hbm [thread:$0]  %s162_s2, 256, %s282_s3, [#allocation4]  }
 0x145   :  { %241 = dma.done.wait [#allocation4], 256  }
 0x146   :  { %242 = vsyncadd [#allocation4], 4294967040 }
 0x147   :  { %168 = vsyncpa [#allocation3], 1 }
 0x148   :  { %169 = vsyncpa [#allocation6], 1 }
 0x149   :  { %170 = vsyncpa [#allocation4], 1 }

</bundles_post_ra>
